<compile_context>
chip_gen: v6e
topology: v6e:2x2x1
jax: 0.10.0
libtpu: 0.0.40
codegen_flags: <defaults>
</compile_context>

<pallas_src>
import functools

import jax
import jax.numpy as jnp
from jax.experimental import pallas as pl
from jax.experimental.pallas import tpu as pltpu

IN_FEATURES = 10
OUT_FEATURES = 10


def module_comparison_kernel(x_ref, w_ref, b_ref, o_ref):
    """o = relu(x @ W + b) for one (tm, IN_FEATURES) batch tile.

    W is layer2's weight transposed to (IN_FEATURES, OUT_FEATURES); the store
    is a narrow (10-lane) masked vst, which is fine -- the store slot has huge
    slack and the HBM side of the DMA is still a contiguous full row.
    """
    acc = jnp.dot(x_ref[...], w_ref[...], preferred_element_type=jnp.float32)
    o_ref[...] = jnp.maximum(acc + b_ref[...], 0.0)


def _batch_tile(batch: int, tm: int) -> int:
    """Pick the per-step batch tile.

    * small B: one full-array step (the op is launch-overhead bound anyway)
    * large B: cap the tile at ~B/2 so the grid has >= 2 parallel steps and
      v7x's dual TensorCores both get work; tile kept sublane-aligned (x8).
    """
    if batch <= 512:
        return batch
    tile = min(tm, -(-batch // 2))     # <= ceil(B/2)  ->  grid >= 2 steps
    tile = max(8, (tile // 8) * 8)     # (8, 128) constraint on 2nd-minor dim
    return tile


@functools.partial(jax.jit, static_argnames=("tm",))
def module_comparison_forward(x, w2_t, b2_row, *, tm=2048):
    """x: (B, 10) f32.  w2_t: (10, 10) f32 (= W2^T).  b2_row: (1, 10) f32."""
    B, f_in = x.shape
    f_out = w2_t.shape[1]
    tile = _batch_tile(B, tm)

    return pl.pallas_call(
        module_comparison_kernel,
        out_shape=jax.ShapeDtypeStruct((B, f_out), jnp.float32),
        grid_spec=pltpu.PrefetchScalarGridSpec(
            num_scalar_prefetch=0,
            grid=(pl.cdiv(B, tile),),
            in_specs=[
                pl.BlockSpec((tile, f_in), lambda i: (i, 0)),   # x batch tile
                pl.BlockSpec((f_in, f_out), lambda i: (0, 0)),  # W2^T (resident)
                pl.BlockSpec((1, f_out), lambda i: (0, 0)),     # b2 (resident)
            ],
            out_specs=pl.BlockSpec((tile, f_out), lambda i: (i, 0)),
        ),
        compiler_params=pltpu.CompilerParams(
            dimension_semantics=("parallel",),  # shard batch steps across v7x's 2 TCs
        ),
    )(x, w2_t, b2_row)


def init_params(key):
    """Three Linear(10,10) layers, PyTorch default init, PyTorch (out,in) layout."""
    keys = jax.random.split(key, 6)
    bound = 1.0 / jnp.sqrt(float(IN_FEATURES))
    params = {}
    for i in range(3):
        w = jax.random.uniform(keys[2 * i], (OUT_FEATURES, IN_FEATURES),
                               jnp.float32, -bound, bound)
        b = jax.random.uniform(keys[2 * i + 1], (OUT_FEATURES,),
                               jnp.float32, -bound, bound)
        params[f"w{i}"] = w
        params[f"b{i}"] = b
    return params


def pack_layer2_for_kernel(params):
    """Transpose layer2's weight to (in, out); bias as a (1, out) row."""
    return params["w2"].T, params["b2"].reshape(1, OUT_FEATURES)


def reference_forward(x, params):
    """Pure-JAX mirror of the PyTorch forward loop (runs all three layers)."""
    out = None
    for i in range(3):
        out = x @ params[f"w{i}"].T + params[f"b{i}"]
        out = jnp.clip(out, 0.0, 6.0) if i == 0 else jnp.maximum(out, 0.0)
    return out


if __name__ == "__main__":
    key = jax.random.PRNGKey(0)
    k_x, k_p = jax.random.split(key)

    B = 1024  # small demo batch; tiles as 2 x (512, 10) parallel grid steps
    x = jax.random.normal(k_x, (B, IN_FEATURES), dtype=jnp.float32)
    params = init_params(k_p)
    w2_t, b2_row = pack_layer2_for_kernel(params)

    out = module_comparison_forward(x, w2_t, b2_row)
    out = jax.block_until_ready(out)

    ref = reference_forward(x, params)
    assert out.shape == (B, OUT_FEATURES)
    assert jnp.allclose(out, ref, atol=1e-5, rtol=1e-5)

    print("KERNEL_OK")
</pallas_src>

<mosaic_0001>
module attributes {stable_mosaic.version = 11 : i64} {
  func.func @module_comparison_kernel(%arg0: i32, %arg1: memref<512x10xf32, #tpu.memory_space<vmem>>, %arg2: memref<10x10xf32, #tpu.memory_space<vmem>>, %arg3: memref<1x10xf32, #tpu.memory_space<vmem>>, %arg4: memref<512x10xf32, #tpu.memory_space<vmem>>) attributes {dimension_semantics = [#tpu.dimension_semantics<parallel>], iteration_bounds = array<i64: 2>, scalar_prefetch = 0 : i64, scratch_operands = 0 : i64, tpu.core_type = #tpu.core_type<tc>, window_params = [{transform_indices = @transform_0, window_bounds = array<i64: 512, 10>}, {pipeline_mode = #tpu.pipeline_mode<synchronous>, transform_indices = @transform_1, window_bounds = array<i64: 10, 10>}, {pipeline_mode = #tpu.pipeline_mode<synchronous>, transform_indices = @transform_2, window_bounds = array<i64: 1, 10>}, {transform_indices = @transform_3, window_bounds = array<i64: 512, 10>}]} {
    %c0 = arith.constant 0 : index
    %c0_0 = arith.constant 0 : index
    %0 = vector.load %arg1[%c0, %c0_0] : memref<512x10xf32, #tpu.memory_space<vmem>>, vector<512x10xf32>
    %c0_1 = arith.constant 0 : index
    %c0_2 = arith.constant 0 : index
    %1 = vector.load %arg2[%c0_1, %c0_2] : memref<10x10xf32, #tpu.memory_space<vmem>>, vector<10x10xf32>
    %cst = arith.constant dense<0.000000e+00> : vector<512x10xf32>
    %2 = tpu.matmul %0, %1, %cst {dimension_numbers = #tpu.dot_dimension_numbers<[1], [0], [0], [1], [0, 0, 1, 1], [], []>} : vector<512x10xf32>, vector<10x10xf32>, vector<512x10xf32> -> vector<512x10xf32>
    %c0_3 = arith.constant 0 : index
    %c0_4 = arith.constant 0 : index
    %3 = vector.load %arg3[%c0_3, %c0_4] : memref<1x10xf32, #tpu.memory_space<vmem>>, vector<1x10xf32>
    %4 = vector.broadcast %3 : vector<1x10xf32> to vector<512x10xf32>
    %5 = arith.addf %2, %4 : vector<512x10xf32>
    %cst_5 = arith.constant 0.000000e+00 : f32
    %6 = vector.broadcast %cst_5 : f32 to vector<512x10xf32>
    %7 = arith.maximumf %5, %6 : vector<512x10xf32>
    %c0_6 = arith.constant 0 : index
    %c0_7 = arith.constant 0 : index
    %8 = vector.load %arg4[%c0_6, %c0_7] : memref<512x10xf32, #tpu.memory_space<vmem>>, vector<512x10xf32>
    tpu.vector_store %arg4[%c0_6, %c0_7], %7 {strides = array<i32>} : memref<512x10xf32, #tpu.memory_space<vmem>>, vector<512x10xf32>,
    return
  }
  func.func @transform_0(%arg0: i32) -> (i32, i32) {
    %c0_i32 = arith.constant 0 : i32
    %c0_i32_0 = arith.constant 0 : i32
    return %arg0, %c0_i32 : i32, i32
  }
  func.func @transform_1(%arg0: i32) -> (i32, i32) {
    %c0_i32 = arith.constant 0 : i32
    %c0_i32_0 = arith.constant 0 : i32
    %c0_i32_1 = arith.constant 0 : i32
    return %c0_i32, %c0_i32_0 : i32, i32
  }
  func.func @transform_2(%arg0: i32) -> (i32, i32) {
    %c0_i32 = arith.constant 0 : i32
    %c0_i32_0 = arith.constant 0 : i32
    %c0_i32_1 = arith.constant 0 : i32
    return %c0_i32, %c0_i32_0 : i32, i32
  }
  func.func @transform_3(%arg0: i32) -> (i32, i32) {
    %c0_i32 = arith.constant 0 : i32
    %c0_i32_0 = arith.constant 0 : i32
    return %arg0, %c0_i32 : i32, i32
  }
}

</mosaic_0001>

<bundles_post_ra>
// kernel: module_comparison_forward.1
= control target key start
LH: loop header
LB: loop body
LE: loop exit
PB: predicated region body
PF: predicated region fallthrough
CT: control target
= control target key end

     0   :  { %s1296_s12 = smov 0   ;;  %s1655_s0 = inlined_call_operand.vmem [shape: f32[1024,10], index: 0, kind: input, shape index: {}]   ;;  %s1656_s1 = inlined_call_operand.vmem [shape: f32[10,10], index: 1, kind: input, shape index: {}]   ;;  %s1657_s2 = inlined_call_operand.vmem [shape: f32[1,10], index: 2, kind: input, shape index: {}]   ;;  %s1658_s3 = inlined_call_operand.vmem [shape: f32[1024,10], index: 3, kind: output, shape index: {}]  }
   0x1 LB: > { %s1013_s13 = sadd.s32 4294967295, %s1274_s12   ;;  %p1017_p0 = scmp.ge.s32.totalorder %s1274_s12, 1  ;;  %s1274_s12 = sphi %s1296_s12, %s13_s12  }
   0x2   : > { %p138_p1 = scmp.lt.s32.totalorder %s1274_s12, 3 }
   0x4   : > { %p139_p2 = pnand %p1017_p0, %p138_p1 }
   0x5   : > { %s1018_s18 = sshll.u32 (!%p139_p2), %s1013_s13, 6 }
   0x6   : > { %142 = sbr.rel (%p139_p2) target bundleno = 277 (0x115), region = 32  ;;  %p163_p3 = scmp.lt.s32.totalorder (!%p139_p2), %s1018_s18, 127 }
   0xb   : > { %v239_v0 = vld [vmem:[%s1656_s1 + $0x8] sm:$0x3]  ;;  %vm440_vm0 = vcmask 1041408   ;;  %v238_v1 = vld [vmem:[%s1656_s1] sm:$0xff]  ;;  %s1660_s18 = smov (!%p163_p3, %s1018_s18), 127  ;;  %vm247_vm1 = vcmask 80896  }
   0xc   : > { %1156 = vmatprep.subr.msk.mxu0 %vm440_vm0, %v239_v0  ;;  %1256 = vmatprep.subr.msk.mxu1 %vm440_vm0, %v239_v0  ;;  %s1019_s19 = sshll.u32 %s1660_s18, 3 }
   0xd   : > { %1157 = vmatpush3.msk.msra.mxu0 %vm440_vm0, %v239_v0  ;;  %1258 = vmatpush3.msk.msra.mxu1 %vm440_vm0, %v239_v0  ;;  %s1318_s22 = scalar_lea.vmem %s1655_s0, %s1019_s19  ;;  %s1460_s27 = scalar_lea.vmem %s1658_s3, %s1019_s19 }
   0xe   : > { %1158 = vmatprep.subr.mxu0 %v238_v1  ;;  %1257 = vmatprep.subr.mxu1 %v238_v1  ;;  %v174_v2 = vld [vmem:[%s1318_s22] sm:$0xff]  ;;  %v175_v4 = vld [vmem:[%s1318_s22 + $0x8] sm:$0xff]  ;;  %v176_v6 = vld [vmem:[%s1318_s22 + $0x10] sm:$0xff] }
   0xf   : > { %1159 = vmatpush3.msra.mxu0 %v238_v1  ;;  %1259 = vmatpush3.msra.mxu1 %v238_v1  ;;  %v206_v3 = vld [vmem:[%s1318_s22 + $0x100] sm:$0xff]  ;;  %v207_v5 = vld [vmem:[%s1318_s22 + $0x108] sm:$0xff]  ;;  %v208_v7 = vld [vmem:[%s1318_s22 + $0x110] sm:$0xff] }
  0x10   : > { %1160 = vmatprep.mubr.msk.f32.mxu0 %vm247_vm1, %v174_v2  ;;  %1208 = vmatprep.mubr.msk.f32.mxu1 %vm247_vm1, %v206_v3  ;;  %v177_v8 = vld [vmem:[%s1318_s22 + $0x18] sm:$0xff]  ;;  %v178_v10 = vld [vmem:[%s1318_s22 + $0x20] sm:$0xff]  ;;  %v179_v12 = vld [vmem:[%s1318_s22 + $0x28] sm:$0xff] }
  0x11   : > { %1161 = vmatmul.mubr.msk.f32.vlgmr.msra.gmra.mxu0 %vm247_vm1, %v175_v4  ;;  %1209 = vmatmul.mubr.msk.f32.vlgmr.msra.gmra.mxu1 %vm247_vm1, %v207_v5  ;;  %v209_v9 = vld [vmem:[%s1318_s22 + $0x118] sm:$0xff]  ;;  %v210_v11 = vld [vmem:[%s1318_s22 + $0x120] sm:$0xff]  ;;  %v211_v13 = vld [vmem:[%s1318_s22 + $0x128] sm:$0xff] }
  0x12   : > { %1163 = vmatprep.mubr.msk.f32.mxu0 %vm247_vm1, %v176_v6  ;;  %1211 = vmatprep.mubr.msk.f32.mxu1 %vm247_vm1, %v208_v7  ;;  %v180_v14 = vld [vmem:[%s1318_s22 + $0x30] sm:$0xff]  ;;  %v181_v16 = vld [vmem:[%s1318_s22 + $0x38] sm:$0xff]  ;;  %v182_v18 = vld [vmem:[%s1318_s22 + $0x40] sm:$0xff] }
  0x13   : > { %v212_v15 = vld [vmem:[%s1318_s22 + $0x130] sm:$0xff]  ;;  %v213_v17 = vld [vmem:[%s1318_s22 + $0x138] sm:$0xff]  ;;  %v214_v19 = vld [vmem:[%s1318_s22 + $0x140] sm:$0xff] }
  0x14   : > { %v183_v20 = vld [vmem:[%s1318_s22 + $0x48] sm:$0xff]  ;;  %v184_v22 = vld [vmem:[%s1318_s22 + $0x50] sm:$0xff]  ;;  %v185_v24 = vld [vmem:[%s1318_s22 + $0x58] sm:$0xff] }
  0x15   : > { %1164 = vmatmul.mubr.msk.f32.gmra.mxu0 %vm247_vm1, %v177_v8  ;;  %1212 = vmatmul.mubr.msk.f32.gmra.mxu1 %vm247_vm1, %v209_v9  ;;  %v215_v21 = vld [vmem:[%s1318_s22 + $0x148] sm:$0xff]  ;;  %v216_v23 = vld [vmem:[%s1318_s22 + $0x150] sm:$0xff]  ;;  %v217_v25 = vld [vmem:[%s1318_s22 + $0x158] sm:$0xff] }
  0x16   : > { %1166 = vmatprep.mubr.msk.f32.mxu0 %vm247_vm1, %v178_v10  ;;  %1214 = vmatprep.mubr.msk.f32.mxu1 %vm247_vm1, %v210_v11  ;;  %v186_v26 = vld [vmem:[%s1318_s22 + $0x60] sm:$0xff]  ;;  %v187_v28 = vld [vmem:[%s1318_s22 + $0x68] sm:$0xff]  ;;  %v188_v30 = vld [vmem:[%s1318_s22 + $0x70] sm:$0xff] }
  0x17   : > { %v218_v27 = vld [vmem:[%s1318_s22 + $0x160] sm:$0xff]  ;;  %v219_v29 = vld [vmem:[%s1318_s22 + $0x168] sm:$0xff]  ;;  %v220_v31 = vld [vmem:[%s1318_s22 + $0x170] sm:$0xff] }
  0x18   : > { %v189_v32 = vld [vmem:[%s1318_s22 + $0x78] sm:$0xff]  ;;  %v190_v34 = vld [vmem:[%s1318_s22 + $0x80] sm:$0xff]  ;;  %v191_v36 = vld [vmem:[%s1318_s22 + $0x88] sm:$0xff] }
  0x19   : > { %1167 = vmatmul.mubr.msk.f32.gmra.mxu0 %vm247_vm1, %v179_v12  ;;  %1215 = vmatmul.mubr.msk.f32.gmra.mxu1 %vm247_vm1, %v211_v13  ;;  %v221_v33 = vld [vmem:[%s1318_s22 + $0x178] sm:$0xff]  ;;  %v222_v35 = vld [vmem:[%s1318_s22 + $0x180] sm:$0xff]  ;;  %v223_v37 = vld [vmem:[%s1318_s22 + $0x188] sm:$0xff] }
  0x1a   : > { %1169 = vmatprep.mubr.msk.f32.mxu0 %vm247_vm1, %v180_v14  ;;  %1217 = vmatprep.mubr.msk.f32.mxu1 %vm247_vm1, %v212_v15  ;;  %v192_v38 = vld [vmem:[%s1318_s22 + $0x90] sm:$0xff]  ;;  %v193_v40 = vld [vmem:[%s1318_s22 + $0x98] sm:$0xff]  ;;  %v194_v42 = vld [vmem:[%s1318_s22 + $0xa0] sm:$0xff] }
  0x1b   : > { %v224_v39 = vld [vmem:[%s1318_s22 + $0x190] sm:$0xff]  ;;  %v225_v41 = vld [vmem:[%s1318_s22 + $0x198] sm:$0xff]  ;;  %v226_v43 = vld [vmem:[%s1318_s22 + $0x1a0] sm:$0xff] }
  0x1c   : > { %v195_v44 = vld [vmem:[%s1318_s22 + $0xa8] sm:$0xff]  ;;  %v196_v46 = vld [vmem:[%s1318_s22 + $0xb0] sm:$0xff]  ;;  %v197_v48 = vld [vmem:[%s1318_s22 + $0xb8] sm:$0xff] }
  0x1d   : > { %1170 = vmatmul.mubr.msk.f32.gmra.mxu0 %vm247_vm1, %v181_v16  ;;  %1218 = vmatmul.mubr.msk.f32.gmra.mxu1 %vm247_vm1, %v213_v17  ;;  %v227_v45 = vld [vmem:[%s1318_s22 + $0x1a8] sm:$0xff]  ;;  %v228_v47 = vld [vmem:[%s1318_s22 + $0x1b0] sm:$0xff]  ;;  %v229_v49 = vld [vmem:[%s1318_s22 + $0x1b8] sm:$0xff] }
  0x1e   : > { %1172 = vmatprep.mubr.msk.f32.mxu0 %vm247_vm1, %v182_v18  ;;  %1220 = vmatprep.mubr.msk.f32.mxu1 %vm247_vm1, %v214_v19  ;;  %v198_v50 = vld [vmem:[%s1318_s22 + $0xc0] sm:$0xff]  ;;  %v199_v52 = vld [vmem:[%s1318_s22 + $0xc8] sm:$0xff]  ;;  %v200_v54 = vld [vmem:[%s1318_s22 + $0xd0] sm:$0xff] }
  0x1f   : > { %v230_v51 = vld [vmem:[%s1318_s22 + $0x1c0] sm:$0xff]  ;;  %v231_v53 = vld [vmem:[%s1318_s22 + $0x1c8] sm:$0xff]  ;;  %v232_v55 = vld [vmem:[%s1318_s22 + $0x1d0] sm:$0xff] }
  0x20   : > { %v201_v56 = vld [vmem:[%s1318_s22 + $0xd8] sm:$0xff]  ;;  %v202_v58 = vld [vmem:[%s1318_s22 + $0xe0] sm:$0xff]  ;;  %v203_v60 = vld [vmem:[%s1318_s22 + $0xe8] sm:$0xff] }
  0x21   : > { %1173 = vmatmul.mubr.msk.f32.gmra.mxu0 %vm247_vm1, %v183_v20  ;;  %1221 = vmatmul.mubr.msk.f32.gmra.mxu1 %vm247_vm1, %v215_v21  ;;  %v233_v57 = vld [vmem:[%s1318_s22 + $0x1d8] sm:$0xff]  ;;  %v234_v59 = vld [vmem:[%s1318_s22 + $0x1e0] sm:$0xff]  ;;  %v235_v61 = vld [vmem:[%s1318_s22 + $0x1e8] sm:$0xff] }
  0x22   : > { %1175 = vmatprep.mubr.msk.f32.mxu0 %vm247_vm1, %v184_v22  ;;  %1223 = vmatprep.mubr.msk.f32.mxu1 %vm247_vm1, %v216_v23  ;;  %v204_v62 = vld [vmem:[%s1318_s22 + $0xf0] sm:$0xff]  ;;  %v205_v0 = vld [vmem:[%s1318_s22 + $0xf8] sm:$0xff]  ;;  %v1451_v2 = vld [vmem:[%s1657_s2] ss:$0 sm:$0xff] }
  0x23   : > { %v236_v63 = vld [vmem:[%s1318_s22 + $0x1f0] sm:$0xff]  ;;  %v237_v1 = vld [vmem:[%s1318_s22 + $0x1f8] sm:$0xff] }
  0x25   : > { %1176 = vmatmul.mubr.msk.f32.gmra.mxu0 %vm247_vm1, %v185_v24  ;;  %1224 = vmatmul.mubr.msk.f32.gmra.mxu1 %vm247_vm1, %v217_v25 }
  0x26   : > { %1178 = vmatprep.mubr.msk.f32.mxu0 %vm247_vm1, %v186_v26  ;;  %1226 = vmatprep.mubr.msk.f32.mxu1 %vm247_vm1, %v218_v27 }
  0x29   : > { %1179 = vmatmul.mubr.msk.f32.gmra.mxu0 %vm247_vm1, %v187_v28  ;;  %1227 = vmatmul.mubr.msk.f32.gmra.mxu1 %vm247_vm1, %v219_v29 }
  0x2a   : > { %1181 = vmatprep.mubr.msk.f32.mxu0 %vm247_vm1, %v188_v30  ;;  %1229 = vmatprep.mubr.msk.f32.mxu1 %vm247_vm1, %v220_v31 }
  0x2d   : > { %1182 = vmatmul.mubr.msk.f32.gmra.mxu0 %vm247_vm1, %v189_v32  ;;  %1230 = vmatmul.mubr.msk.f32.gmra.mxu1 %vm247_vm1, %v221_v33 }
  0x2e   : > { %1184 = vmatprep.mubr.msk.f32.mxu0 %vm247_vm1, %v190_v34  ;;  %1232 = vmatprep.mubr.msk.f32.mxu1 %vm247_vm1, %v222_v35 }
  0x31   : > { %1185 = vmatmul.mubr.msk.f32.gmra.mxu0 %vm247_vm1, %v191_v36  ;;  %1233 = vmatmul.mubr.msk.f32.gmra.mxu1 %vm247_vm1, %v223_v37 }
  0x32   : > { %1187 = vmatprep.mubr.msk.f32.mxu0 %vm247_vm1, %v192_v38  ;;  %1235 = vmatprep.mubr.msk.f32.mxu1 %vm247_vm1, %v224_v39 }
  0x35   : > { %1188 = vmatmul.mubr.msk.f32.gmra.mxu0 %vm247_vm1, %v193_v40  ;;  %1236 = vmatmul.mubr.msk.f32.gmra.mxu1 %vm247_vm1, %v225_v41 }
  0x36   : > { %1190 = vmatprep.mubr.msk.f32.mxu0 %vm247_vm1, %v194_v42  ;;  %1238 = vmatprep.mubr.msk.f32.mxu1 %vm247_vm1, %v226_v43 }
  0x39   : > { %1191 = vmatmul.mubr.msk.f32.gmra.mxu0 %vm247_vm1, %v195_v44  ;;  %1239 = vmatmul.mubr.msk.f32.gmra.mxu1 %vm247_vm1, %v227_v45 }
  0x3a   : > { %1193 = vmatprep.mubr.msk.f32.mxu0 %vm247_vm1, %v196_v46  ;;  %1241 = vmatprep.mubr.msk.f32.mxu1 %vm247_vm1, %v228_v47 }
  0x3d   : > { %1194 = vmatmul.mubr.msk.f32.gmra.mxu0 %vm247_vm1, %v197_v48  ;;  %1242 = vmatmul.mubr.msk.f32.gmra.mxu1 %vm247_vm1, %v229_v49 }
  0x3e   : > { %1196 = vmatprep.mubr.msk.f32.mxu0 %vm247_vm1, %v198_v50  ;;  %1244 = vmatprep.mubr.msk.f32.mxu1 %vm247_vm1, %v230_v51 }
  0x41   : > { %1197 = vmatmul.mubr.msk.f32.gmra.mxu0 %vm247_vm1, %v199_v52  ;;  %1245 = vmatmul.mubr.msk.f32.gmra.mxu1 %vm247_vm1, %v231_v53 }
  0x42   : > { %1199 = vmatprep.mubr.msk.f32.mxu0 %vm247_vm1, %v200_v54  ;;  %1247 = vmatprep.mubr.msk.f32.mxu1 %vm247_vm1, %v232_v55 }
  0x45   : > { %1200 = vmatmul.mubr.msk.f32.gmra.mxu0 %vm247_vm1, %v201_v56  ;;  %1248 = vmatmul.mubr.msk.f32.gmra.mxu1 %vm247_vm1, %v233_v57 }
  0x46   : > { %1202 = vmatprep.mubr.msk.f32.mxu0 %vm247_vm1, %v202_v58  ;;  %1250 = vmatprep.mubr.msk.f32.mxu1 %vm247_vm1, %v234_v59 }
  0x49   : > { %1203 = vmatmul.mubr.msk.f32.gmra.mxu0 %vm247_vm1, %v203_v60  ;;  %1251 = vmatmul.mubr.msk.f32.gmra.mxu1 %vm247_vm1, %v235_v61 }
  0x4a   : > { %1205 = vmatprep.mubr.msk.f32.mxu0 %vm247_vm1, %v204_v62  ;;  %1253 = vmatprep.mubr.msk.f32.mxu1 %vm247_vm1, %v236_v63 }
  0x4d   : > { %1206 = vmatmul.mubr.msk.f32.gmra.mxu0 %vm247_vm1, %v205_v0  ;;  %1254 = vmatmul.mubr.msk.f32.gmra.mxu1 %vm247_vm1, %v237_v1 }
  0xd1   : > { %v1162_v3 = vpop.f32.mrf.mxu0  ;;  %v1210_v4 = vpop.f32.mrf.mxu1 }
  0xd2   : > { %v516_v5 = vadd.f32 %v1162_v3, %v1451_v2  ;;  %v676_v6 = vadd.f32 %v1210_v4, %v1451_v2 }
  0xd3   : > { %v510_v7 = vpop.f32.mrf.mxu0  ;;  %v670_v8 = vpop.f32.mrf.mxu1 }
  0xd4   : > { %v830_v9 = vmax.f32 %v516_v5, 0.0  ;;  %v862_v10 = vmax.f32 %v676_v6, 0.0  ;;  %v511_v11 = vadd.f32 %v1451_v2, %v510_v7  ;;  %v671_v12 = vadd.f32 %v1451_v2, %v670_v8 }
  0xd5   : > { %v1165_v13 = vpop.f32.mrf.mxu0  ;;  %v1213_v14 = vpop.f32.mrf.mxu1 }
  0xd6   : > { %894 = vst.msk [vmem:[%s1460_s27 + $0x8] sm:$0xff] %vm247_vm1, %v830_v9  ;;  %926 = vst.msk [vmem:[%s1460_s27 + $0x108] sm:$0xff] %vm247_vm1, %v862_v10  ;;  %v829_v15 = vmax.f32 %v511_v11, 0.0  ;;  %v861_v16 = vmax.f32 %v671_v12, 0.0  ;;  %v526_v17 = vadd.f32 %v1165_v13, %v1451_v2  ;;  %v686_v18 = vadd.f32 %v1213_v14, %v1451_v2 }
  0xd7   : > { %v520_v19 = vpop.f32.mrf.mxu0  ;;  %v680_v20 = vpop.f32.mrf.mxu1 }
  0xd8   : > { %893 = vst.msk [vmem:[%s1460_s27] sm:$0xff] %vm247_vm1, %v829_v15  ;;  %925 = vst.msk [vmem:[%s1460_s27 + $0x100] sm:$0xff] %vm247_vm1, %v861_v16  ;;  %v832_v21 = vmax.f32 %v526_v17, 0.0  ;;  %v864_v22 = vmax.f32 %v686_v18, 0.0  ;;  %v521_v23 = vadd.f32 %v1451_v2, %v520_v19  ;;  %v681_v24 = vadd.f32 %v1451_v2, %v680_v20 }
  0xd9   : > { %v1168_v25 = vpop.f32.mrf.mxu0  ;;  %v1216_v26 = vpop.f32.mrf.mxu1 }
  0xda   : > { %896 = vst.msk [vmem:[%s1460_s27 + $0x18] sm:$0xff] %vm247_vm1, %v832_v21  ;;  %928 = vst.msk [vmem:[%s1460_s27 + $0x118] sm:$0xff] %vm247_vm1, %v864_v22  ;;  %v831_v27 = vmax.f32 %v521_v23, 0.0  ;;  %v863_v28 = vmax.f32 %v681_v24, 0.0  ;;  %v536_v29 = vadd.f32 %v1168_v25, %v1451_v2  ;;  %v696_v30 = vadd.f32 %v1216_v26, %v1451_v2 }
  0xdb   : > { %v530_v31 = vpop.f32.mrf.mxu0  ;;  %v690_v32 = vpop.f32.mrf.mxu1 }
  0xdc   : > { %895 = vst.msk [vmem:[%s1460_s27 + $0x10] sm:$0xff] %vm247_vm1, %v831_v27  ;;  %927 = vst.msk [vmem:[%s1460_s27 + $0x110] sm:$0xff] %vm247_vm1, %v863_v28  ;;  %v834_v33 = vmax.f32 %v536_v29, 0.0  ;;  %v866_v34 = vmax.f32 %v696_v30, 0.0  ;;  %v531_v35 = vadd.f32 %v1451_v2, %v530_v31  ;;  %v691_v36 = vadd.f32 %v1451_v2, %v690_v32 }
  0xdd   : > { %v1171_v37 = vpop.f32.mrf.mxu0  ;;  %v1219_v38 = vpop.f32.mrf.mxu1 }
  0xde   : > { %898 = vst.msk [vmem:[%s1460_s27 + $0x28] sm:$0xff] %vm247_vm1, %v834_v33  ;;  %930 = vst.msk [vmem:[%s1460_s27 + $0x128] sm:$0xff] %vm247_vm1, %v866_v34  ;;  %v833_v39 = vmax.f32 %v531_v35, 0.0  ;;  %v865_v40 = vmax.f32 %v691_v36, 0.0  ;;  %v546_v41 = vadd.f32 %v1171_v37, %v1451_v2  ;;  %v706_v42 = vadd.f32 %v1219_v38, %v1451_v2 }
  0xdf   : > { %v540_v43 = vpop.f32.mrf.mxu0  ;;  %v700_v44 = vpop.f32.mrf.mxu1 }
  0xe0   : > { %897 = vst.msk [vmem:[%s1460_s27 + $0x20] sm:$0xff] %vm247_vm1, %v833_v39  ;;  %929 = vst.msk [vmem:[%s1460_s27 + $0x120] sm:$0xff] %vm247_vm1, %v865_v40  ;;  %v836_v45 = vmax.f32 %v546_v41, 0.0  ;;  %v868_v46 = vmax.f32 %v706_v42, 0.0  ;;  %v541_v47 = vadd.f32 %v1451_v2, %v540_v43  ;;  %v701_v48 = vadd.f32 %v1451_v2, %v700_v44 }
  0xe1   : > { %v1174_v49 = vpop.f32.mrf.mxu0  ;;  %v1222_v50 = vpop.f32.mrf.mxu1 }
  0xe2   : > { %900 = vst.msk [vmem:[%s1460_s27 + $0x38] sm:$0xff] %vm247_vm1, %v836_v45  ;;  %932 = vst.msk [vmem:[%s1460_s27 + $0x138] sm:$0xff] %vm247_vm1, %v868_v46  ;;  %v835_v51 = vmax.f32 %v541_v47, 0.0  ;;  %v867_v52 = vmax.f32 %v701_v48, 0.0  ;;  %v556_v53 = vadd.f32 %v1174_v49, %v1451_v2  ;;  %v716_v54 = vadd.f32 %v1222_v50, %v1451_v2 }
  0xe3   : > { %v550_v55 = vpop.f32.mrf.mxu0  ;;  %v710_v56 = vpop.f32.mrf.mxu1 }
  0xe4   : > { %899 = vst.msk [vmem:[%s1460_s27 + $0x30] sm:$0xff] %vm247_vm1, %v835_v51  ;;  %931 = vst.msk [vmem:[%s1460_s27 + $0x130] sm:$0xff] %vm247_vm1, %v867_v52  ;;  %v838_v57 = vmax.f32 %v556_v53, 0.0  ;;  %v870_v58 = vmax.f32 %v716_v54, 0.0  ;;  %v551_v59 = vadd.f32 %v1451_v2, %v550_v55  ;;  %v711_v60 = vadd.f32 %v1451_v2, %v710_v56 }
  0xe5   : > { %v1177_v61 = vpop.f32.mrf.mxu0  ;;  %v1225_v62 = vpop.f32.mrf.mxu1 }
  0xe6   : > { %902 = vst.msk [vmem:[%s1460_s27 + $0x48] sm:$0xff] %vm247_vm1, %v838_v57  ;;  %934 = vst.msk [vmem:[%s1460_s27 + $0x148] sm:$0xff] %vm247_vm1, %v870_v58  ;;  %v837_v63 = vmax.f32 %v551_v59, 0.0  ;;  %v869_v0 = vmax.f32 %v711_v60, 0.0  ;;  %v566_v1 = vadd.f32 %v1177_v61, %v1451_v2  ;;  %v726_v3 = vadd.f32 %v1225_v62, %v1451_v2 }
  0xe7   : > { %v560_v4 = vpop.f32.mrf.mxu0  ;;  %v720_v5 = vpop.f32.mrf.mxu1 }
  0xe8   : > { %901 = vst.msk [vmem:[%s1460_s27 + $0x40] sm:$0xff] %vm247_vm1, %v837_v63  ;;  %933 = vst.msk [vmem:[%s1460_s27 + $0x140] sm:$0xff] %vm247_vm1, %v869_v0  ;;  %v840_v6 = vmax.f32 %v566_v1, 0.0  ;;  %v872_v7 = vmax.f32 %v726_v3, 0.0  ;;  %v561_v8 = vadd.f32 %v1451_v2, %v560_v4  ;;  %v721_v9 = vadd.f32 %v1451_v2, %v720_v5 }
  0xe9   : > { %v1180_v10 = vpop.f32.mrf.mxu0  ;;  %v1228_v11 = vpop.f32.mrf.mxu1 }
  0xea   : > { %904 = vst.msk [vmem:[%s1460_s27 + $0x58] sm:$0xff] %vm247_vm1, %v840_v6  ;;  %936 = vst.msk [vmem:[%s1460_s27 + $0x158] sm:$0xff] %vm247_vm1, %v872_v7  ;;  %v839_v12 = vmax.f32 %v561_v8, 0.0  ;;  %v871_v13 = vmax.f32 %v721_v9, 0.0  ;;  %v576_v14 = vadd.f32 %v1180_v10, %v1451_v2  ;;  %v736_v15 = vadd.f32 %v1228_v11, %v1451_v2 }
  0xeb   : > { %v570_v16 = vpop.f32.mrf.mxu0  ;;  %v730_v17 = vpop.f32.mrf.mxu1 }
  0xec   : > { %903 = vst.msk [vmem:[%s1460_s27 + $0x50] sm:$0xff] %vm247_vm1, %v839_v12  ;;  %935 = vst.msk [vmem:[%s1460_s27 + $0x150] sm:$0xff] %vm247_vm1, %v871_v13  ;;  %v842_v18 = vmax.f32 %v576_v14, 0.0  ;;  %v874_v19 = vmax.f32 %v736_v15, 0.0  ;;  %v571_v20 = vadd.f32 %v1451_v2, %v570_v16  ;;  %v731_v21 = vadd.f32 %v1451_v2, %v730_v17 }
  0xed   : > { %v1183_v22 = vpop.f32.mrf.mxu0  ;;  %v1231_v23 = vpop.f32.mrf.mxu1 }
  0xee   : > { %906 = vst.msk [vmem:[%s1460_s27 + $0x68] sm:$0xff] %vm247_vm1, %v842_v18  ;;  %938 = vst.msk [vmem:[%s1460_s27 + $0x168] sm:$0xff] %vm247_vm1, %v874_v19  ;;  %v841_v24 = vmax.f32 %v571_v20, 0.0  ;;  %v873_v25 = vmax.f32 %v731_v21, 0.0  ;;  %v586_v26 = vadd.f32 %v1183_v22, %v1451_v2  ;;  %v746_v27 = vadd.f32 %v1231_v23, %v1451_v2 }
  0xef   : > { %v580_v28 = vpop.f32.mrf.mxu0  ;;  %v740_v29 = vpop.f32.mrf.mxu1 }
  0xf0   : > { %905 = vst.msk [vmem:[%s1460_s27 + $0x60] sm:$0xff] %vm247_vm1, %v841_v24  ;;  %937 = vst.msk [vmem:[%s1460_s27 + $0x160] sm:$0xff] %vm247_vm1, %v873_v25  ;;  %v844_v30 = vmax.f32 %v586_v26, 0.0  ;;  %v876_v31 = vmax.f32 %v746_v27, 0.0  ;;  %v581_v32 = vadd.f32 %v1451_v2, %v580_v28  ;;  %v741_v33 = vadd.f32 %v1451_v2, %v740_v29 }
  0xf1   : > { %v1186_v34 = vpop.f32.mrf.mxu0  ;;  %v1234_v35 = vpop.f32.mrf.mxu1 }
  0xf2   : > { %908 = vst.msk [vmem:[%s1460_s27 + $0x78] sm:$0xff] %vm247_vm1, %v844_v30  ;;  %940 = vst.msk [vmem:[%s1460_s27 + $0x178] sm:$0xff] %vm247_vm1, %v876_v31  ;;  %v843_v36 = vmax.f32 %v581_v32, 0.0  ;;  %v875_v37 = vmax.f32 %v741_v33, 0.0  ;;  %v596_v38 = vadd.f32 %v1186_v34, %v1451_v2  ;;  %v756_v39 = vadd.f32 %v1234_v35, %v1451_v2 }
  0xf3   : > { %v590_v40 = vpop.f32.mrf.mxu0  ;;  %v750_v41 = vpop.f32.mrf.mxu1 }
  0xf4   : > { %907 = vst.msk [vmem:[%s1460_s27 + $0x70] sm:$0xff] %vm247_vm1, %v843_v36  ;;  %939 = vst.msk [vmem:[%s1460_s27 + $0x170] sm:$0xff] %vm247_vm1, %v875_v37  ;;  %v846_v42 = vmax.f32 %v596_v38, 0.0  ;;  %v878_v43 = vmax.f32 %v756_v39, 0.0  ;;  %v591_v44 = vadd.f32 %v1451_v2, %v590_v40  ;;  %v751_v45 = vadd.f32 %v1451_v2, %v750_v41 }
  0xf5   : > { %v1189_v46 = vpop.f32.mrf.mxu0  ;;  %v1237_v47 = vpop.f32.mrf.mxu1 }
  0xf6   : > { %910 = vst.msk [vmem:[%s1460_s27 + $0x88] sm:$0xff] %vm247_vm1, %v846_v42  ;;  %942 = vst.msk [vmem:[%s1460_s27 + $0x188] sm:$0xff] %vm247_vm1, %v878_v43  ;;  %v845_v48 = vmax.f32 %v591_v44, 0.0  ;;  %v877_v49 = vmax.f32 %v751_v45, 0.0  ;;  %v606_v50 = vadd.f32 %v1189_v46, %v1451_v2  ;;  %v766_v51 = vadd.f32 %v1237_v47, %v1451_v2 }
  0xf7   : > { %v600_v52 = vpop.f32.mrf.mxu0  ;;  %v760_v53 = vpop.f32.mrf.mxu1 }
  0xf8   : > { %909 = vst.msk [vmem:[%s1460_s27 + $0x80] sm:$0xff] %vm247_vm1, %v845_v48  ;;  %941 = vst.msk [vmem:[%s1460_s27 + $0x180] sm:$0xff] %vm247_vm1, %v877_v49  ;;  %v848_v54 = vmax.f32 %v606_v50, 0.0  ;;  %v880_v55 = vmax.f32 %v766_v51, 0.0  ;;  %v601_v56 = vadd.f32 %v1451_v2, %v600_v52  ;;  %v761_v57 = vadd.f32 %v1451_v2, %v760_v53 }
  0xf9   : > { %v1192_v58 = vpop.f32.mrf.mxu0  ;;  %v1240_v59 = vpop.f32.mrf.mxu1 }
  0xfa   : > { %912 = vst.msk [vmem:[%s1460_s27 + $0x98] sm:$0xff] %vm247_vm1, %v848_v54  ;;  %944 = vst.msk [vmem:[%s1460_s27 + $0x198] sm:$0xff] %vm247_vm1, %v880_v55  ;;  %v847_v60 = vmax.f32 %v601_v56, 0.0  ;;  %v879_v61 = vmax.f32 %v761_v57, 0.0  ;;  %v616_v62 = vadd.f32 %v1192_v58, %v1451_v2  ;;  %v776_v63 = vadd.f32 %v1240_v59, %v1451_v2 }
  0xfb   : > { %v610_v0 = vpop.f32.mrf.mxu0  ;;  %v770_v1 = vpop.f32.mrf.mxu1 }
  0xfc   : > { %911 = vst.msk [vmem:[%s1460_s27 + $0x90] sm:$0xff] %vm247_vm1, %v847_v60  ;;  %943 = vst.msk [vmem:[%s1460_s27 + $0x190] sm:$0xff] %vm247_vm1, %v879_v61  ;;  %v850_v3 = vmax.f32 %v616_v62, 0.0  ;;  %v882_v4 = vmax.f32 %v776_v63, 0.0  ;;  %v611_v5 = vadd.f32 %v1451_v2, %v610_v0  ;;  %v771_v6 = vadd.f32 %v1451_v2, %v770_v1 }
  0xfd   : > { %v1195_v7 = vpop.f32.mrf.mxu0  ;;  %v1243_v8 = vpop.f32.mrf.mxu1 }
  0xfe   : > { %914 = vst.msk [vmem:[%s1460_s27 + $0xa8] sm:$0xff] %vm247_vm1, %v850_v3  ;;  %946 = vst.msk [vmem:[%s1460_s27 + $0x1a8] sm:$0xff] %vm247_vm1, %v882_v4  ;;  %v849_v9 = vmax.f32 %v611_v5, 0.0  ;;  %v881_v10 = vmax.f32 %v771_v6, 0.0  ;;  %v626_v11 = vadd.f32 %v1195_v7, %v1451_v2  ;;  %v786_v12 = vadd.f32 %v1243_v8, %v1451_v2 }
  0xff   : > { %v620_v13 = vpop.f32.mrf.mxu0  ;;  %v780_v14 = vpop.f32.mrf.mxu1 }
 0x100   : > { %913 = vst.msk [vmem:[%s1460_s27 + $0xa0] sm:$0xff] %vm247_vm1, %v849_v9  ;;  %945 = vst.msk [vmem:[%s1460_s27 + $0x1a0] sm:$0xff] %vm247_vm1, %v881_v10  ;;  %v852_v15 = vmax.f32 %v626_v11, 0.0  ;;  %v884_v16 = vmax.f32 %v786_v12, 0.0  ;;  %v621_v17 = vadd.f32 %v1451_v2, %v620_v13  ;;  %v781_v18 = vadd.f32 %v1451_v2, %v780_v14 }
 0x101   : > { %v1198_v19 = vpop.f32.mrf.mxu0  ;;  %v1246_v20 = vpop.f32.mrf.mxu1 }
 0x102   : > { %916 = vst.msk [vmem:[%s1460_s27 + $0xb8] sm:$0xff] %vm247_vm1, %v852_v15  ;;  %948 = vst.msk [vmem:[%s1460_s27 + $0x1b8] sm:$0xff] %vm247_vm1, %v884_v16  ;;  %v851_v21 = vmax.f32 %v621_v17, 0.0  ;;  %v883_v22 = vmax.f32 %v781_v18, 0.0  ;;  %v636_v23 = vadd.f32 %v1198_v19, %v1451_v2  ;;  %v796_v24 = vadd.f32 %v1246_v20, %v1451_v2 }
 0x103   : > { %v630_v25 = vpop.f32.mrf.mxu0  ;;  %v790_v26 = vpop.f32.mrf.mxu1 }
 0x104   : > { %915 = vst.msk [vmem:[%s1460_s27 + $0xb0] sm:$0xff] %vm247_vm1, %v851_v21  ;;  %947 = vst.msk [vmem:[%s1460_s27 + $0x1b0] sm:$0xff] %vm247_vm1, %v883_v22  ;;  %v854_v27 = vmax.f32 %v636_v23, 0.0  ;;  %v886_v28 = vmax.f32 %v796_v24, 0.0  ;;  %v631_v29 = vadd.f32 %v1451_v2, %v630_v25  ;;  %v791_v30 = vadd.f32 %v1451_v2, %v790_v26 }
 0x105   : > { %v1201_v31 = vpop.f32.mrf.mxu0  ;;  %v1249_v32 = vpop.f32.mrf.mxu1 }
 0x106   : > { %918 = vst.msk [vmem:[%s1460_s27 + $0xc8] sm:$0xff] %vm247_vm1, %v854_v27  ;;  %950 = vst.msk [vmem:[%s1460_s27 + $0x1c8] sm:$0xff] %vm247_vm1, %v886_v28  ;;  %v853_v33 = vmax.f32 %v631_v29, 0.0  ;;  %v885_v34 = vmax.f32 %v791_v30, 0.0  ;;  %v646_v35 = vadd.f32 %v1201_v31, %v1451_v2  ;;  %v806_v36 = vadd.f32 %v1249_v32, %v1451_v2 }
 0x107   : > { %v640_v37 = vpop.f32.mrf.mxu0  ;;  %v800_v38 = vpop.f32.mrf.mxu1 }
 0x108   : > { %917 = vst.msk [vmem:[%s1460_s27 + $0xc0] sm:$0xff] %vm247_vm1, %v853_v33  ;;  %949 = vst.msk [vmem:[%s1460_s27 + $0x1c0] sm:$0xff] %vm247_vm1, %v885_v34  ;;  %v856_v39 = vmax.f32 %v646_v35, 0.0  ;;  %v888_v40 = vmax.f32 %v806_v36, 0.0  ;;  %v641_v41 = vadd.f32 %v1451_v2, %v640_v37  ;;  %v801_v42 = vadd.f32 %v1451_v2, %v800_v38 }
 0x109   : > { %v1204_v43 = vpop.f32.mrf.mxu0  ;;  %v1252_v44 = vpop.f32.mrf.mxu1 }
 0x10a   : > { %920 = vst.msk [vmem:[%s1460_s27 + $0xd8] sm:$0xff] %vm247_vm1, %v856_v39  ;;  %952 = vst.msk [vmem:[%s1460_s27 + $0x1d8] sm:$0xff] %vm247_vm1, %v888_v40  ;;  %v855_v45 = vmax.f32 %v641_v41, 0.0  ;;  %v887_v46 = vmax.f32 %v801_v42, 0.0  ;;  %v656_v47 = vadd.f32 %v1204_v43, %v1451_v2  ;;  %v816_v48 = vadd.f32 %v1252_v44, %v1451_v2 }
 0x10b   : > { %v650_v49 = vpop.f32.mrf.mxu0  ;;  %v810_v50 = vpop.f32.mrf.mxu1 }
 0x10c   : > { %919 = vst.msk [vmem:[%s1460_s27 + $0xd0] sm:$0xff] %vm247_vm1, %v855_v45  ;;  %951 = vst.msk [vmem:[%s1460_s27 + $0x1d0] sm:$0xff] %vm247_vm1, %v887_v46  ;;  %v858_v51 = vmax.f32 %v656_v47, 0.0  ;;  %v890_v52 = vmax.f32 %v816_v48, 0.0  ;;  %v651_v53 = vadd.f32 %v1451_v2, %v650_v49  ;;  %v811_v54 = vadd.f32 %v1451_v2, %v810_v50 }
 0x10d   : > { %v1207_v55 = vpop.f32.mrf.mxu0  ;;  %v1255_v56 = vpop.f32.mrf.mxu1 }
 0x10e   : > { %922 = vst.msk [vmem:[%s1460_s27 + $0xe8] sm:$0xff] %vm247_vm1, %v858_v51  ;;  %954 = vst.msk [vmem:[%s1460_s27 + $0x1e8] sm:$0xff] %vm247_vm1, %v890_v52  ;;  %v857_v57 = vmax.f32 %v651_v53, 0.0  ;;  %v889_v58 = vmax.f32 %v811_v54, 0.0  ;;  %v666_v59 = vadd.f32 %v1207_v55, %v1451_v2  ;;  %v826_v60 = vadd.f32 %v1255_v56, %v1451_v2 }
 0x10f   : > { %v660_v61 = vpop.f32.mrf.mxu0  ;;  %v820_v62 = vpop.f32.mrf.mxu1 }
 0x110   : > { %921 = vst.msk [vmem:[%s1460_s27 + $0xe0] sm:$0xff] %vm247_vm1, %v857_v57  ;;  %953 = vst.msk [vmem:[%s1460_s27 + $0x1e0] sm:$0xff] %vm247_vm1, %v889_v58  ;;  %v860_v63 = vmax.f32 %v666_v59, 0.0  ;;  %v892_v0 = vmax.f32 %v826_v60, 0.0  ;;  %v661_v1 = vadd.f32 %v1451_v2, %v660_v61  ;;  %v821_v3 = vadd.f32 %v1451_v2, %v820_v62 }
 0x112   : > { %924 = vst.msk [vmem:[%s1460_s27 + $0xf8] sm:$0xff] %vm247_vm1, %v860_v63  ;;  %956 = vst.msk [vmem:[%s1460_s27 + $0x1f8] sm:$0xff] %vm247_vm1, %v892_v0  ;;  %v859_v4 = vmax.f32 %v661_v1, 0.0  ;;  %v891_v5 = vmax.f32 %v821_v3, 0.0 }
 0x114   : > { %923 = vst.msk [vmem:[%s1460_s27 + $0xf0] sm:$0xff] %vm247_vm1, %v859_v4  ;;  %955 = vst.msk [vmem:[%s1460_s27 + $0x1f0] sm:$0xff] %vm247_vm1, %v891_v5 }
 0x115 PF: > { %s13_s12 = sadd.s32 1, %s1274_s12  }
 0x116   : > { %p10_p4 = scmp.ge.s32.totalorder %s13_s12, 4  }
 0x118   :  { %12 = sbr.rel (!%p10_p4) target bundleno = 1 (0x1), region = 62 }

</bundles_post_ra>
